<compile_context>
chip_gen: v5e
topology: v5e:2x2
jax: 0.10.0
libtpu: 0.0.40
codegen_flags: <defaults>
</compile_context>

<pallas_src>
import jax
import jax.numpy as jnp
from jax import lax
from jax.experimental import pallas as pl
from jax.experimental.pallas import tpu as pltpu


_MAX_BLOCK_BYTES = 6 * 1024 * 1024      # per-block byte budget (input or output)
_VMEM_LIMIT_BYTES = 48 * 1024 * 1024    # 2*in + 2*out + f32 temps ~ 5-6x blocks;
                                        # <= physical VMEM on v5e/v6e/v7x
_MIN_PARALLEL_STEPS = 4                 # keep >=2 (ideally >=4) steps for v7x's 2 TCs


def _pixelnorm_kernel(x_ref, o_ref):
    # Block: (B_TILE, C, TILE_HW).  The channel reduction (axis=1) is fully
    # inside every block, so no accumulator is needed.  Mean-square + rsqrt
    # run in f32 (bf16 accumulation over C=512 loses precision; rsqrt lands on
    # the EUP slot so it is ~free); the final scaling is done in the input
    # dtype so no full-block f32 copy feeds the output path.
    x = x_ref[...]
    xf = x.astype(jnp.float32)
    ms = jnp.mean(xf * xf, axis=1, keepdims=True)        # (B_TILE, 1, TILE_HW), f32
    scale = lax.rsqrt(ms + 1e-8).astype(x.dtype)
    o_ref[...] = (x * scale).astype(o_ref.dtype)


def _round_down_multiple(v: int, m: int) -> int:
    return max(m, (v // m) * m)


def pixel_norm(x: jax.Array) -> jax.Array:
    """PixelNorm over the channel dim of an NCHW tensor (matches the PyTorch module)."""
    n, c, h, w = x.shape
    hw = h * w
    x3 = x.reshape(n, c, hw)
    itemsize = jnp.dtype(x.dtype).itemsize

    if hw >= 128:
        # Main path: lane-tile the HW axis; the C reduction stays in-block.
        # tile_hw comes from the byte budget and does not need to divide hw
        # (Pallas masks the edge block; per-lane independence makes the
        # padded lanes harmless).
        lanes_budget = max(128, (_MAX_BLOCK_BYTES // (c * itemsize)) // 128 * 128)
        tile_hw = min(lanes_budget, _round_down_multiple(hw, 128))
        # Ensure a few parallel grid steps even for tiny N so v7x's two
        # TensorCores both get work (harmless on single-TC v5e/v6e).
        if n * pl.cdiv(hw, tile_hw) < _MIN_PARALLEL_STEPS:
            want = pl.cdiv(hw, _MIN_PARALLEL_STEPS)
            tile_hw = min(tile_hw, max(128, pl.cdiv(want, 128) * 128))
        grid = (n, pl.cdiv(hw, tile_hw))
        block = (1, c, tile_hw)
        index_map = lambda i, j: (i, 0, j)
        dims = ("parallel", "parallel")
    else:
        # Small feature maps (hw < 128, e.g. the 4x4 / 8x8 StyleGAN2 layers):
        # keep the full HW extent (block dim == full array dim satisfies the
        # (8,128) rule) and batch several images per grid step so DMAs stay
        # large and per-step overhead is amortized.
        # TODO(synk): when C % 128 == 0 a lane-dense (N, HW, C) layout would
        # avoid masked sub-128-lane stores, but these layers are tiny.
        max_imgs = max(1, _MAX_BLOCK_BYTES // (c * hw * itemsize))
        b_tile = min(n, max_imgs)
        grid = (pl.cdiv(n, b_tile),)
        block = (b_tile, c, hw)
        index_map = lambda i: (i, 0, 0)
        dims = ("parallel",)

    out3 = pl.pallas_call(
        _pixelnorm_kernel,
        out_shape=jax.ShapeDtypeStruct((n, c, hw), x.dtype),
        grid_spec=pltpu.PrefetchScalarGridSpec(
            num_scalar_prefetch=0,
            grid=grid,
            in_specs=[pl.BlockSpec(block, index_map)],
            out_specs=pl.BlockSpec(block, index_map),
        ),
        compiler_params=pltpu.CompilerParams(
            dimension_semantics=dims,
            vmem_limit_bytes=_VMEM_LIMIT_BYTES,
        ),
    )(x3)

    return out3.reshape(n, c, h, w)


def _ref_pixelnorm(x):
    xf = x.astype(jnp.float32)
    return (xf * lax.rsqrt(jnp.mean(xf * xf, axis=1, keepdims=True) + 1e-8)
            ).astype(x.dtype)


if __name__ == "__main__":
    key = jax.random.PRNGKey(0)

    # 1) Main path, f32, HW a multiple of 128 (tile_hw shrinks to give >=4 steps).
    x = jax.random.normal(key, (2, 4, 16, 16), dtype=jnp.float32)
    out = pixel_norm(x)
    jax.block_until_ready(out)
    ref = _ref_pixelnorm(x)
    assert out.shape == x.shape and out.dtype == x.dtype
    assert jnp.allclose(out, ref, atol=1e-5, rtol=1e-5)

    # 2) Main path with a masked edge block (HW >= 128 but not a multiple of 128).
    x2 = jax.random.normal(jax.random.PRNGKey(2), (1, 8, 12, 17), dtype=jnp.float32)
    out2 = pixel_norm(x2)
    jax.block_until_ready(out2)
    ref2 = _ref_pixelnorm(x2)
    assert out2.shape == x2.shape and out2.dtype == x2.dtype
    assert jnp.allclose(out2, ref2, atol=1e-5, rtol=1e-5)

    # 3) Small-feature-map (batch-blocked) path with bf16 input.
    xs = jax.random.normal(jax.random.PRNGKey(1), (4, 8, 4, 4), dtype=jnp.bfloat16)
    outs = pixel_norm(xs)
    jax.block_until_ready(outs)
    refs = _ref_pixelnorm(xs)
    assert outs.shape == xs.shape and outs.dtype == xs.dtype
    assert jnp.allclose(outs.astype(jnp.float32), refs.astype(jnp.float32),
                        atol=2e-2, rtol=2e-2)

    print("KERNEL_OK")
</pallas_src>

<mosaic_0001>
module attributes {stable_mosaic.version = 11 : i64} {
  func.func @_pixelnorm_kernel(%arg0: i32, %arg1: i32, %arg2: memref<1x4x128xf32, #tpu.memory_space<vmem>>, %arg3: memref<1x4x128xf32, #tpu.memory_space<vmem>>) attributes {dimension_semantics = [#tpu.dimension_semantics<parallel>, #tpu.dimension_semantics<parallel>], iteration_bounds = array<i64: 2, 2>, scalar_prefetch = 0 : i64, scratch_operands = 0 : i64, tpu.core_type = #tpu.core_type<tc>, window_params = [{transform_indices = @transform_0, window_bounds = array<i64: 1, 4, 128>}, {transform_indices = @transform_1, window_bounds = array<i64: 1, 4, 128>}]} {
    %c0 = arith.constant 0 : index
    %c0_0 = arith.constant 0 : index
    %c0_1 = arith.constant 0 : index
    %0 = vector.load %arg2[%c0, %c0_0, %c0_1] : memref<1x4x128xf32, #tpu.memory_space<vmem>>, vector<1x4x128xf32>
    %1 = arith.mulf %0, %0 : vector<1x4x128xf32>
    %cst = arith.constant dense<0.000000e+00> : vector<1x128xf32>
    %2 = vector.multi_reduction <add>, %1, %cst [1] : vector<1x4x128xf32> to vector<1x128xf32>
    %3 = vector.shape_cast %2 : vector<1x128xf32> to vector<1x1x128xf32>
    %cst_2 = arith.constant 4.000000e+00 : f32
    %4 = vector.broadcast %cst_2 : f32 to vector<1x1x128xf32>
    %5 = arith.divf %3, %4 : vector<1x1x128xf32>
    %cst_3 = arith.constant 9.99999993E-9 : f32
    %6 = vector.broadcast %cst_3 : f32 to vector<1x1x128xf32>
    %7 = arith.addf %5, %6 : vector<1x1x128xf32>
    %8 = math.rsqrt %7 : vector<1x1x128xf32>
    %9 = vector.broadcast %8 : vector<1x1x128xf32> to vector<1x4x128xf32>
    %10 = arith.mulf %0, %9 : vector<1x4x128xf32>
    %c0_4 = arith.constant 0 : index
    %c0_5 = arith.constant 0 : index
    %c0_6 = arith.constant 0 : index
    %11 = vector.load %arg3[%c0_4, %c0_5, %c0_6] : memref<1x4x128xf32, #tpu.memory_space<vmem>>, vector<1x4x128xf32>
    tpu.vector_store %arg3[%c0_4, %c0_5, %c0_6], %10 {strides = array<i32>} : memref<1x4x128xf32, #tpu.memory_space<vmem>>, vector<1x4x128xf32>,
    return
  }
  func.func @transform_0(%arg0: i32, %arg1: i32) -> (i32, i32, i32) {
    %c0_i32 = arith.constant 0 : i32
    %c0_i32_0 = arith.constant 0 : i32
    return %arg0, %c0_i32, %arg1 : i32, i32, i32
  }
  func.func @transform_1(%arg0: i32, %arg1: i32) -> (i32, i32, i32) {
    %c0_i32 = arith.constant 0 : i32
    %c0_i32_0 = arith.constant 0 : i32
    return %arg0, %c0_i32, %arg1 : i32, i32, i32
  }
}

</mosaic_0001>

<bundles_post_ra>
// kernel: tpu_custom_call.1
= control target key start
LH: loop header
LB: loop body
LE: loop exit
PB: predicated region body
PF: predicated region fallthrough
CT: control target
= control target key end

     0   :  { %6 = vsyncpa [#allocation3], 0  ;;  %s671_s0 = inlined_call_operand.hbm [shape: f32[2,4,256], index: 0, kind: input, shape index: {}]   ;;  %s672_s1 = inlined_call_operand.hbm [shape: f32[2,4,256], index: 1, kind: output, shape index: {}]  }
   0x1   :  { %8 = vsyncpa [#allocation3 + $0x1], 0 }
   0x2   :  { %9 = vsyncpa [#allocation4], 0 }
   0x3   :  { %11 = vsyncpa [#allocation4 + $0x1], 0  ;;  %s525_s6 = smov 0   ;;  %s527_s7 = smov 0  }
   0x4   :  { %s529_s8 = smov 0   ;;  %s531_s9 = smov 0  }
   0x5   :  { %s533_s10 = smov 0   ;;  %s535_s11 = smov 0  }
   0x6   :  { %s537_s12 = smov 0   ;;  %s539_s13 = smov 0  }
   0x7 LB: > { %s286_s14 = sadd.s32 4294967295, %s512_s13   ;;  %s287_s15 = sadd.s32 4294967294, %s512_s13   ;;  %s512_s13 = sphi %s539_s13, %s17_s13   ;;  %s508_s12 = sphi %s537_s12, %s683_s12   ;;  %s504_s11 = sphi %s535_s11, %s682_s11   ;;  %s500_s10 = sphi %s533_s10, %s681_s10   ;;  %s496_s9 = sphi %s531_s9, %s680_s9   ;;  %s492_s8 = sphi %s529_s8, %s679_s8   ;;  %s488_s7 = sphi %s527_s7, %s678_s7   ;;  %s484_s6 = sphi %s525_s6, %s677_s6  }
   0x8   : > { %s26_s16 = sadd.s32 1, %s504_s11  ;;  %s29_s17 = sadd.s32 1, %s508_s12 }
   0x9   : > { %p27_p0 = scmp.ge.s32.totalorder %s26_s16, 2  ;;  %s38_s18 = sadd.s32 1, %s492_s8 }
   0xa   : > { %p45_p1 = scmp.ne.s32.totalorder %s492_s8, %s488_s7  ;;  %p46_p2 = scmp.eq.s32.totalorder %s512_s13, 0 }
   0xb   : > { %s685_s16 = smov (%p27_p0, %s26_s16), 0  ;;  %s687_s17 = smov (!%p27_p0, %s29_s17), %s508_s12 }
   0xc   : > { %s34_s19 = ssub.s32 %s504_s11, %s685_s16  ;;  %p578_p3 = por %p46_p2, %p45_p1 }
   0xd   : > { %p31_p4 = scmp.ge.s32.totalorder %s687_s17, 2  ;;  %p51_p5 = scmp.ne.s32.totalorder %s488_s7, %s484_s6 }
   0xe   : > { %p52_p6 = scmp.eq.s32.totalorder %s286_s14, 0  ;;  %p77_p7 = scmp.eq.s32.totalorder %s286_s14, 3 }
   0xf   : > { %s689_s17 = smov (%p31_p4, %s687_s17), 0  ;;  %p83_p10 = scmp.eq.s32.totalorder %s287_s15, 3 }
  0x10   : > { %p586_p8 = por %p52_p6, %p51_p5  ;;  %p590_p9 = por %p77_p7, %p45_p1 }
  0x11   : > { %s33_s23 = ssub.s32 %s508_s12, %s689_s17  ;;  %p596_p12 = por %p83_p10, %p51_p5 }
  0x12   : > { %s35_s24 = sor.u32 %s34_s19, %s33_s23  ;;  %p313_p13 = scmp.lt.s32.totalorder %s512_s13, 4 }
  0x13   : > { %p36_p11 = scmp.eq.s32.totalorder %s35_s24, 0  ;;  %s103_s26 = sand.u32 1, %s492_s8  }
  0x14   : > { %s290_s28 = sshll.u32 %s103_s26, 2  ;;  %s291_s29 = sshll.u32 %s508_s12, 1 }
  0x15   : > { %s603_s27 = scalar_select %p36_p11, %s492_s8, %s38_s18  }
  0x16   : > { %s111_s30 = sadd.s32 %s504_s11, %s291_s29  ;;  %s107_s2 = scalar_lea.vmem [#allocation2], %s290_s28 }
  0x17   : > { %s117_s3 = sshll.u32 %s107_s2, 4  ;;  %s292_s4 = sshll.u32 %s111_s30, 2  ;;  %s118_s3 = int_to_ptr.vmem [resolvable:$true] %s117_s3 }
  0x18   : > { %s113_s15 = scalar_lea.hbm %s671_s0, %s292_s4  ;;  %p306_p0 = pnand %p313_p13, %p578_p3 }
  0x19   : > { %s115_s19 = sshll.u32 %s113_s15, 4  ;;  %p293_p1 = scmp.ge.s32.totalorder %s512_s13, 1  ;;  %s116_s19 = int_to_ptr.hbm [resolvable:$true] %s115_s19 }
  0x1a   : > { %s104_s23 = scalar_lea.sflag [#allocation3], %s103_s26  ;;  %p122_p2 = scmp.lt.s32.totalorder %s512_s13, 5 }
  0x1b   : > { %308 = dma.hbm_to_vmem [thread:$0]  (!%p306_p0), %s116_s19, 64, %s118_s3, %s104_s23  }
  0x1c   : > { %p123_p4 = pnand %p293_p1, %p122_p2 }
  0x1d   : > { %s615_s18 = sand.u32 (!%p123_p4), 1, %s488_s7  }
  0x1e   : > { %126 = sbr.rel (%p123_p4) target bundleno = 80 (0x50), region = 24  ;;  %s294_s24 = sshll.u32 (!%p123_p4), %s615_s18, 2 }
  0x1f   : > { %s129_s28 = scalar_lea.sflag (!%p123_p4), [#allocation3], %s615_s18  ;;  %s132_s20 = scalar_lea.vmem (!%p123_p4), [#allocation2], %s294_s24 }
  0x23   : > { %475 = dma.done.wait (%p586_p8), %s129_s28, 64  }
  0x24   : > { %477 = vsyncadd (%p586_p8), %s129_s28, 4294967232  ;;  %v514_v0 = vmov 4.0   ;;  %v152_v2 = vld [vmem:[%s132_s20] sm:$0xf]  ;;  %vm154_vm0 = vcmask 1043456   ;;  %s297_s21 = sshll.u32 %s500_s10, 1 }
  0x25   : > { %380 = vrcp.f32 %v514_v0  ;;  %v153_v3 = vmul.f32 %v152_v2, %v152_v2  ;;  %s194_s26 = sadd.s32 %s496_s9, %s297_s21  ;;  %s151_s4 = scalar_lea.vmem [#allocation5], %s294_s24 }
  0x26   : > { %s298_s29 = sshll.u32 %s194_s26, 2  ;;  %s198_s10 = sshll.u32 %s151_s4, 4  ;;  %s199_s10 = int_to_ptr.vmem [resolvable:$true] %s198_s10 }
  0x27   : > { %v155_v5 = vsel %vm154_vm0, %v153_v3, 0.0  ;;  %s196_s3 = scalar_lea.hbm %s672_s1, %s298_s29  ;;  %s184_s9 = scalar_lea.sflag [#allocation4], %s615_s18 }
  0x28   : > { %v156_v7 = vrot.slane %v155_v5, 4  ;;  %s200_s5 = sshll.u32 %s196_s3, 4  ;;  %s434_s28 = scalar_lea.hbm %s672_s1, 16  ;;  %s201_s5 = int_to_ptr.hbm [resolvable:$true] %s200_s5 }
  0x29   : > { %s428_s14 = sshra.s32 %s201_s5, 4  ;;  %s429_s14 = int_to_ptr.hbm [resolvable:$true] %s428_s14 }
  0x2a   : > { %v157_v9 = vadd.f32 %v156_v7, %v155_v5  ;;  %s430_s15 = scalar_lea.hbm %s429_s14, 4  ;;  %p435_p7 = scmp.lt.s32.totalorder %s429_s14, %s672_s1 }
  0x2b   : > { %v381_v1 = vpop.eup %380  ;;  %p431_p3 = scmp.ne.s32.totalorder %s429_s14, %s430_s15  ;;  %p436_p8 = scmp.lt.s32.totalorder %s434_s28, %s430_s15 }
  0x2c   : > { %v163_v4 = vmul.f32 4.0, %v381_v1  ;;  %v158_v10 = vrot.slane %v157_v9, 2  ;;  %vm167_vm1 = vweird.f32 %v381_v1 }
  0x2d   : > { %p432_p5 = pnand %p431_p3, %p590_p9  ;;  %p437_p10 = por %p436_p8, %p435_p7 }
  0x2e   : > { %v164_v6 = vsub.f32 1.0, %v163_v4  ;;  %v159_v12 = vadd.f32 %v158_v10, %v157_v9 }
  0x2f   : > { %p433_p6 = pneg %p432_p5 }
  0x30   : > { %v165_v8 = vmul.f32 %v381_v1, %v164_v6  ;;  %v160_v13 = vrot.slane %v159_v12, 1 }
  0x31   : > { %p438_p11 = pnand %p437_p10, %p433_p6 }
  0x32   : > { %v166_v11 = vadd.f32 %v381_v1, %v165_v8  ;;  %v161_v15 = vadd.f32 %v160_v13, %v159_v12 }
  0x34   : > { %v168_v14 = vsel %vm167_vm1, %v381_v1, %v166_v11 }
  0x35   : > { %v169_v16 = vmul.f32 %v168_v14, %v161_v15 }
  0x37   : > { %v170_v17 = vadd.f32 1e-08, %v169_v16 }
  0x39   : > { %382 = vrsqrt.f32 %v170_v17  ;;  %vm177_vm2 = vweird.f32 %v170_v17 }
  0x3f   : > { %v383_v18 = vpop.eup %382 }
  0x40   : > { %v172_v19 = vmul.f32 %v383_v18, %v170_v17  ;;  %vm178_vm3 = vweird.f32 %v383_v18 }
  0x41   : > { %vm179_vm4 = vmor %vm177_vm2, %vm178_vm3 }
  0x42   : > { %v173_v20 = vmul.f32 %v383_v18, %v172_v19 }
  0x44   : > { %v174_v21 = vmul.f32 0.5, %v173_v20 }
  0x46   : > { %v175_v22 = vsub.f32 1.5, %v174_v21 }
  0x48   : > { %v176_v23 = vmul.f32 %v383_v18, %v175_v22 }
  0x4a   : > { %v180_v24 = vsel %vm179_vm4, %v383_v18, %v176_v23 }
  0x4b   : > { %v181_v25 = vmul.f32 %v180_v24, %v152_v2 }
  0x4d   : > { %182 = vst [vmem:[%s151_s4] sm:$0xf] %v181_v25 }
  0x4e   : > { %441 = shalt.err (!%p438_p11)
}
  0x4f   : > { %303 = dma.vmem_to_hbm [thread:$0]  (%p590_p9), %s199_s10, 64, %s201_s5, %s184_s9  }
  0x50 PF: > { %p314_p13 = scmp.ge.s32.totalorder %s512_s13, 2  ;;  %s212_s18 = sand.u32 1, %s484_s6  }
  0x51   : > { %s213_s21 = scalar_lea.sflag [#allocation4], %s212_s18 }
  0x52   : > { %p310_p0 = pnand %p314_p13, %p596_p12 }
  0x54   : > { %p311_p1 = pneg %p310_p0 }
  0x56   : > { %479 = dma.done.wait (%p311_p1), %s213_s21, 64  }
  0x57   : > { %481 = vsyncadd (%p311_p1), %s213_s21, 4294967232  ;;  %s17_s13 = sadd.s32 1, %s512_s13   ;;  %s677_s6 = smov %s488_s7 }
  0x58   : > { %p14_p2 = scmp.ge.s32.totalorder %s17_s13, 6   ;;  %s678_s7 = smov %s492_s8 }
  0x59   : > { %s679_s8 = smov %s603_s27  ;;  %s680_s9 = smov %s504_s11 }
  0x5a   : > { %s681_s10 = smov %s508_s12  ;;  %s682_s11 = smov %s685_s16 }
  0x5b   : > { %s683_s12 = smov %s689_s17  ;;  %16 = sbr.rel (!%p14_p2) target bundleno = 7 (0x7), region = 69 }
  0x60   :  { %219 = vsyncpa [#allocation3], 1 }
  0x61   :  { %221 = vsyncpa [#allocation3 + $0x1], 1 }
  0x62   :  { %222 = vsyncpa [#allocation4], 1 }
  0x63   :  { %224 = vsyncpa [#allocation4 + $0x1], 1 }

</bundles_post_ra>
